<compile_context>
chip_gen: v7x
topology: tpu7x:2x2x1
jax: 0.10.0
libtpu: 0.0.40
codegen_flags: <defaults>
</compile_context>

<pallas_src>
import jax
import jax.numpy as jnp
from jax.experimental import pallas as pl
from jax.experimental.pallas import tpu as pltpu


def ensemble_forward(x_nchw, weights_mdc, biases_mc, ens_weights_m):
    """Weighted ensemble of linear classifiers, fused into one Pallas call.

    x_nchw        : [B, C_in, H, W]  float32
    weights_mdc   : [M, D, NUM_CLASSES]  (D = C_in*H*W), per-model weights
    biases_mc     : [M, NUM_CLASSES]
    ens_weights_m : [M]  raw (un-normalized) ensemble weights
    returns       : [B, NUM_CLASSES]  float32
    """
    B = x_nchw.shape[0]
    M, D, C = weights_mdc.shape

    LANE = 128
    C_pad = ((C + LANE - 1) // LANE) * LANE  # lane-dense output width

    # ---- wrapper-side prep (layout + ensemble fold, done in f32) ------------
    # Normalize ensemble weights exactly like the PyTorch module (f32).
    ew = ens_weights_m.astype(jnp.float32)
    ew = ew / jnp.sum(ew)

    # Fold the ensemble reduction into one effective classifier.  Weighted sum
    # in f32, THEN a single bf16 cast (preserves the module's "f32 weights
    # applied after matmul" semantics within bf16 matmul tolerance).
    w_eff_f32 = jnp.einsum("m,mdc->dc", ew, weights_mdc.astype(jnp.float32))   # [D, C]
    b_eff_f32 = ew @ biases_mc.astype(jnp.float32)                             # [C]

    # Zero-pad the class dim to a multiple of 128 so the kernel output block
    # is lane-dense (unmasked vst); slice back after the call.
    w_eff = jnp.pad(w_eff_f32, ((0, 0), (0, C_pad - C))).astype(jnp.bfloat16)  # [D, Cp]
    b_eff = jnp.pad(b_eff_f32, (0, C_pad - C)).reshape(1, C_pad)               # [1, Cp] f32

    # Flatten NCHW exactly like torch .reshape(B, -1); ship as bf16 operand.
    x_flat = x_nchw.reshape(B, D).astype(jnp.bfloat16)

    def kernel(x_ref, w_ref, b_ref, o_ref):
        """Single invocation, no grid (everything fits in one VMEM block).

        x_ref : VMEM (B, D)    bf16 flattened input
        w_ref : VMEM (D, Cp)   bf16 folded ensemble weights
        b_ref : VMEM (1, Cp)   f32  folded ensemble bias
        o_ref : VMEM (B, Cp)   f32  ensemble output (lane-dense)
        """
        # One MXU matmul (bf16 in, f32 accumulate) + one VPU bias add.
        y = jnp.dot(x_ref[...], w_ref[...],
                    preferred_element_type=jnp.float32)          # [B, Cp] f32
        o_ref[...] = (y + b_ref[...]).astype(o_ref.dtype)

    cost = pl.CostEstimate(
        flops=2 * B * D * C_pad,
        transcendentals=0,
        bytes_accessed=(B * D * 2          # x  bf16
                        + D * C_pad * 2    # W_eff bf16
                        + C_pad * 4        # b_eff f32
                        + B * C_pad * 4),  # out f32
    )

    out_padded = pl.pallas_call(
        kernel,
        out_shape=jax.ShapeDtypeStruct((B, C_pad), jnp.float32),
        in_specs=[
            pl.BlockSpec(memory_space=pltpu.MemorySpace.VMEM),   # x_flat
            pl.BlockSpec(memory_space=pltpu.MemorySpace.VMEM),   # W_eff
            pl.BlockSpec(memory_space=pltpu.MemorySpace.VMEM),   # b_eff
        ],
        out_specs=pl.BlockSpec(memory_space=pltpu.MemorySpace.VMEM),
        cost_estimate=cost,
        compiler_params=pltpu.CompilerParams(
            vmem_limit_bytes=32 * 1024 * 1024),
    )(x_flat, w_eff, b_eff)

    # Drop the lane padding back to the true class count.
    return out_padded[:, :C]


if __name__ == "__main__":
    # Small, deterministic setup: 3 sub-models, input [2, 4, 16, 16], 16 classes.
    B, CH, H, W = 2, 4, 16, 16
    D = CH * H * W          # 1024
    NUM_CLASSES = 16
    M = 3                   # number of ensemble members

    key = jax.random.PRNGKey(0)
    kx, kw, kb = jax.random.split(key, 3)

    x = jax.random.normal(kx, (B, CH, H, W), dtype=jnp.float32)
    weights = jax.random.normal(kw, (M, D, NUM_CLASSES), dtype=jnp.float32) * 0.02
    biases = jax.random.normal(kb, (M, NUM_CLASSES), dtype=jnp.float32) * 0.01
    # Un-normalized ensemble weights (module normalizes them internally).
    ens_weights = jnp.array([1.0, 2.0, 3.0], dtype=jnp.float32)

    out = ensemble_forward(x, weights, biases, ens_weights)
    out = jax.block_until_ready(out)
    assert out.shape == (B, NUM_CLASSES)

    # Pure-JAX references.
    x_flat = x.reshape(B, D)
    wn = ens_weights / jnp.sum(ens_weights)

    # (a) precision-matched reference: fold in f32, bf16 matmul operands,
    #     f32 accumulate, f32 bias — mirrors the kernel's arithmetic exactly.
    w_eff_ref = jnp.einsum("m,mdc->dc", wn, weights)
    xb = x_flat.astype(jnp.bfloat16).astype(jnp.float32)
    wb = w_eff_ref.astype(jnp.bfloat16).astype(jnp.float32)
    ref_bf16 = xb @ wb + wn @ biases
    assert jnp.allclose(out, ref_bf16, atol=1e-3, rtol=1e-3), \
        "mismatch vs bf16-matched reference"

    # (b) loose sanity check against the full-f32 module math.
    ref_f32 = sum(wn[i] * (x_flat @ weights[i] + biases[i]) for i in range(M))
    assert jnp.allclose(out, ref_f32, atol=5e-2, rtol=5e-2), \
        "mismatch vs f32 reference"

    print("KERNEL_OK")
</pallas_src>

<mosaic_0001>
module attributes {stable_mosaic.version = 11 : i64} {
  func.func @kernel(%arg0: memref<2x1024xbf16, #tpu.memory_space<vmem>>, %arg1: memref<1024x128xbf16, #tpu.memory_space<vmem>>, %arg2: memref<1x128xf32, #tpu.memory_space<vmem>>, %arg3: memref<2x128xf32, #tpu.memory_space<vmem>>) attributes {dimension_semantics = [], scalar_prefetch = 0 : i64, scratch_operands = 0 : i64, tpu.core_type = #tpu.core_type<tc>} {
    %c0 = arith.constant 0 : index
    %c0_0 = arith.constant 0 : index
    %0 = vector.load %arg0[%c0, %c0_0] : memref<2x1024xbf16, #tpu.memory_space<vmem>>, vector<2x1024xbf16>
    %c0_1 = arith.constant 0 : index
    %c0_2 = arith.constant 0 : index
    %1 = vector.load %arg1[%c0_1, %c0_2] : memref<1024x128xbf16, #tpu.memory_space<vmem>>, vector<1024x128xbf16>
    %cst = arith.constant dense<0.000000e+00> : vector<2x128xf32>
    %2 = tpu.matmul %0, %1, %cst {dimension_numbers = #tpu.dot_dimension_numbers<[1], [0], [0], [1], [0, 0, 1, 1], [], []>} : vector<2x1024xbf16>, vector<1024x128xbf16>, vector<2x128xf32> -> vector<2x128xf32>
    %c0_3 = arith.constant 0 : index
    %c0_4 = arith.constant 0 : index
    %3 = vector.load %arg2[%c0_3, %c0_4] : memref<1x128xf32, #tpu.memory_space<vmem>>, vector<1x128xf32>
    %4 = vector.broadcast %3 : vector<1x128xf32> to vector<2x128xf32>
    %5 = arith.addf %2, %4 : vector<2x128xf32>
    %c0_5 = arith.constant 0 : index
    %c0_6 = arith.constant 0 : index
    %6 = vector.load %arg3[%c0_5, %c0_6] : memref<2x128xf32, #tpu.memory_space<vmem>>, vector<2x128xf32>
    tpu.vector_store %arg3[%c0_5, %c0_6], %5 {strides = array<i32>} : memref<2x128xf32, #tpu.memory_space<vmem>>, vector<2x128xf32>,
    return
  }
}

</mosaic_0001>

<bundles_post_ra>
// kernel: tpu_custom_call.1
= control target key start
LH: loop header
LB: loop body
LE: loop exit
PB: predicated region body
PF: predicated region fallthrough
CT: control target
= control target key end

     0   :  { %8 = vsyncpa [#allocation3], 0  ;;  %s1178_s0 = inlined_call_operand.hbm [shape: bf16[2,1024], index: 0, kind: input, shape index: {}]   ;;  %s1179_s1 = inlined_call_operand.hbm [shape: bf16[1024,128], index: 1, kind: input, shape index: {}]   ;;  %s1180_s2 = inlined_call_operand.vmem [shape: f32[1,128], index: 2, kind: input, shape index: {}]   ;;  %s1181_s3 = inlined_call_operand.hbm [shape: f32[2,128], index: 3, kind: output, shape index: {}]  }
   0x1   :  { %9 = vsyncpa [#allocation6], 0 }
   0x2   :  { %10 = vsyncpa [#allocation4], 0  ;;  %s1093_s12 = smov [#allocation2]   ;;  %s1094_s14 = smov [#allocation5]  }
   0x3   :  { %s17_s13 = sshll.u32 %s1093_s12, 4  ;;  %s26_s15 = sshll.u32 %s1094_s14, 4  ;;  %s18_s13 = int_to_ptr.vmem [resolvable:$true] %s17_s13  ;;  %s1119_s15 = int_to_ptr.vmem [resolvable:$true] %s26_s15 }
   0x4   :  { %s1021_s18 = scalar_lea.hbm %s1178_s0, 128 }
   0x5   :  { %p1022_p0 = scmp.ne.s32.totalorder %s1178_s0, %s1021_s18  ;;  %p1025_p1 = scmp.lt.u32.totalorder %s1021_s18, %s1178_s0 }
   0x7   :  { %p1027_p2 = pnand %p1025_p1, %p1022_p0 }
   0x9   :  { %1030 = shalt.err (!%p1027_p2)
}
   0xa   :  { %s1031_s23 = scalar_lea.vmem %s18_s13, 128  ;;  %p1036_p4 = scmp.lt.s32.totalorder %s18_s13, %s18_s13 }
   0xb   :  { %p1032_p3 = scmp.ne.s32.totalorder %s18_s13, %s1031_s23  ;;  %p1037_p5 = scmp.lt.s32.totalorder %s1031_s23, %s1031_s23 }
   0xd   :  { %p1038_p6 = por %p1037_p5, %p1036_p4 }
   0xf   :  { %p1039_p7 = pnand %p1038_p6, %p1032_p3 }
  0x11   :  { %1042 = shalt.err (!%p1039_p7)
}
  0x12   :  { %20 = dma.hbm_to_vmem [thread:$0]  %s1178_s0, 128, %s18_s13, [#allocation3]  }
  0x13   :  { %s1043_s28 = scalar_lea.hbm %s1179_s1, 8192 }
  0x14   :  { %p1044_p8 = scmp.ne.s32.totalorder %s1179_s1, %s1043_s28  ;;  %p1047_p9 = scmp.lt.u32.totalorder %s1043_s28, %s1179_s1 }
  0x16   :  { %p1049_p10 = pnand %p1047_p9, %p1044_p8 }
  0x18   :  { %1052 = shalt.err (!%p1049_p10)
}
  0x19   :  { %s1053_s6 = scalar_lea.vmem %s1119_s15, 8192  ;;  %p1058_p12 = scmp.lt.s32.totalorder %s1119_s15, %s1119_s15 }
  0x1a   :  { %p1054_p11 = scmp.ne.s32.totalorder %s1119_s15, %s1053_s6  ;;  %p1059_p13 = scmp.lt.s32.totalorder %s1053_s6, %s1053_s6 }
  0x1c   :  { %p1060_p0 = por %p1059_p13, %p1058_p12 }
  0x1e   :  { %p1061_p1 = pnand %p1060_p0, %p1054_p11 }
  0x20   :  { %1064 = shalt.err (!%p1061_p1)
}
  0x21   :  { %s1095_s0 = smov 64   ;;  %s1096_s7 = smov 4  }
  0x22   :  { %32 = dma.hbm_to_vmem [thread:$0]  %s1179_s1, 8192, %s1119_s15, [#allocation6], %s1095_s0, %s1095_s0, %s1096_s7  }
  0x23   :  { %1087 = dma.done.wait [#allocation3], 128  }
  0x24   :  { %1088 = vsyncadd [#allocation3], 4294967168 }
  0x25   :  { %1089 = dma.done.wait [#allocation6], 8192  }
  0x26   :  { %1090 = vsyncadd [#allocation6], 4294959104  ;;  %v956_v0 = vld [vmem:[#allocation5 + $0x40] sm:$0xff]   ;;  %v960_v4 = vld [vmem:[#allocation5 + $0x48] sm:$0xff]   ;;  %v1097_v22 = vmov 1966171168   ;;  %v183_v24 = vlaneseq }
  0x27   :  { %v957_v1 = vld [vmem:[#allocation5 + $0xc0] sm:$0xff]   ;;  %862 = vmatprep.subr.bf16.mxu0 %v956_v0  ;;  %v961_v5 = vld [vmem:[#allocation5 + $0xc8] sm:$0xff]   ;;  %v964_v8 = vld [vmem:[#allocation5 + $0x50] sm:$0xff]   ;;  %v181_v23 = vunpack.c.l.s4 %v1097_v22  ;;  %s1098_s11 = smov [#allocation7]  }
  0x28   :  { %v958_v2 = vld [vmem:[#allocation5] sm:$0xff]   ;;  %884 = vmatprep.subr.bf16.mxu1 %v957_v1  ;;  %v962_v6 = vld [vmem:[#allocation5 + $0x8] sm:$0xff]   ;;  %v965_v9 = vld [vmem:[#allocation5 + $0xd0] sm:$0xff]   ;;  %v184_v30 = vshrl.u32 %v183_v24, 7 }
  0x29   :  { %v959_v3 = vld [vmem:[#allocation5 + $0x80] sm:$0xff]   ;;  %863 = vmatpush3.bf16.msra.mxu0 %v958_v2  ;;  %v963_v7 = vld [vmem:[#allocation5 + $0x88] sm:$0xff]   ;;  %v966_v10 = vld [vmem:[#allocation5 + $0x10] sm:$0xff]   ;;  %v182_v29 = vunpack.c.0.s8 %v181_v23 }
  0x2a   :  { %885 = vmatpush3.bf16.msra.mxu1 %v959_v3  ;;  %864 = vmatprep.subr.bf16.mxu0 %v960_v4  ;;  %v967_v11 = vld [vmem:[#allocation5 + $0x90] sm:$0xff]   ;;  %v968_v12 = vld [vmem:[#allocation5 + $0x58] sm:$0xff]   ;;  %v972_v16 = vld [vmem:[#allocation5 + $0x60] sm:$0xff]  }
  0x2b   :  { %886 = vmatprep.subr.bf16.mxu1 %v961_v5  ;;  %v969_v13 = vld [vmem:[#allocation5 + $0xd8] sm:$0xff]   ;;  %v973_v17 = vld [vmem:[#allocation5 + $0xe0] sm:$0xff]   ;;  %v976_v20 = vld [vmem:[#allocation5 + $0x68] sm:$0xff]   ;;  %v1150_v35 = vsub.s32 %v182_v29, %v184_v30 }
  0x2c   :  { %v970_v14 = vld [vmem:[#allocation5 + $0x18] sm:$0xff]   ;;  %v974_v18 = vld [vmem:[#allocation5 + $0x20] sm:$0xff]   ;;  %v977_v21 = vld [vmem:[#allocation5 + $0xe8] sm:$0xff]  }
  0x2d   :  { %865 = vmatpush3.bf16.msra.mxu0 %v962_v6  ;;  %v971_v15 = vld [vmem:[#allocation5 + $0x98] sm:$0xff]   ;;  %v975_v19 = vld [vmem:[#allocation5 + $0xa0] sm:$0xff]   ;;  %v978_v25 = vld [vmem:[#allocation5 + $0x28] sm:$0xff]  }
  0x2e   :  { %887 = vmatpush3.bf16.msra.mxu1 %v963_v7  ;;  %866 = vmatprep.subr.bf16.mxu0 %v964_v8  ;;  %v979_v26 = vld [vmem:[#allocation5 + $0xa8] sm:$0xff]   ;;  %v980_v27 = vld [vmem:[#allocation5 + $0x70] sm:$0xff]   ;;  %v984_v33 = vld [vmem:[#allocation5 + $0x78] sm:$0xff]  }
  0x2f   :  { %888 = vmatprep.subr.bf16.mxu1 %v965_v9  ;;  %v981_v28 = vld [vmem:[#allocation5 + $0xf0] sm:$0xff]   ;;  %v985_v34 = vld [vmem:[#allocation5 + $0xf8] sm:$0xff]   ;;  %v989_v41 = vld [vmem:[#allocation5 + $0x140] sm:$0xff]  }
  0x30   :  { %v982_v31 = vld [vmem:[#allocation5 + $0x30] sm:$0xff]   ;;  %v986_v36 = vld [vmem:[#allocation5 + $0x38] sm:$0xff]   ;;  %v990_v42 = vld [vmem:[#allocation5 + $0x1c0] sm:$0xff]  }
  0x31   :  { %867 = vmatpush3.bf16.msra.mxu0 %v966_v10  ;;  %v983_v32 = vld [vmem:[#allocation5 + $0xb0] sm:$0xff]   ;;  %v987_v37 = vld [vmem:[#allocation5 + $0xb8] sm:$0xff]   ;;  %v991_v47 = vld [vmem:[#allocation5 + $0x100] sm:$0xff]  }
  0x32   :  { %889 = vmatpush3.bf16.msra.mxu1 %v967_v11  ;;  %868 = vmatprep.subr.bf16.mxu0 %v968_v12  ;;  %v42_v38 = vld [vmem:[#allocation2] sm:$0xff]  ;;  %v993_v50 = vld [vmem:[#allocation5 + $0x148] sm:$0xff]   ;;  %v992_v52 = vld [vmem:[#allocation5 + $0x180] sm:$0xff]  }
  0x33   :  { %890 = vmatprep.subr.bf16.mxu1 %v969_v13  ;;  %v179_v39 = vcombine.high %v42_v38, %v42_v38  ;;  %v186_v40 = vrot.slane %v42_v38, %v1150_v35  ;;  %v994_v54 = vld [vmem:[#allocation5 + $0x1c8] sm:$0xff]   ;;  %v997_v57 = vld [vmem:[#allocation5 + $0x150] sm:$0xff]   ;;  %v1001_v61 = vld [vmem:[#allocation5 + $0x158] sm:$0xff]  }
  0x34   :  { %v995_v55 = vld [vmem:[#allocation5 + $0x108] sm:$0xff]   ;;  %v998_v59 = vld [vmem:[#allocation5 + $0x1d0] sm:$0xff]   ;;  %v1002_v63 = vld [vmem:[#allocation5 + $0x1d8] sm:$0xff]  }
  0x35   :  { %869 = vmatpush3.bf16.msra.mxu0 %v970_v14  ;;  %v194_v43 = vcombine.high %v186_v40, %v186_v40  ;;  %v202_v44 = vrot.slane %v186_v40, %v1150_v35  ;;  %v1155_v45 = vrot.slane %v179_v39, %v1150_v35  ;;  %v996_v58 = vld [vmem:[#allocation5 + $0x188] sm:$0xff]   ;;  %v999_v60 = vld [vmem:[#allocation5 + $0x110] sm:$0xff]   ;;  %v1003_v0 = vld [vmem:[#allocation5 + $0x118] sm:$0xff]  }
  0x36   :  { %891 = vmatpush3.bf16.msra.mxu1 %v971_v15  ;;  %870 = vmatprep.subr.bf16.mxu0 %v972_v16  ;;  %v1000_v62 = vld [vmem:[#allocation5 + $0x190] sm:$0xff]   ;;  %v1005_v1 = vld [vmem:[#allocation5 + $0x160] sm:$0xff]   ;;  %v1004_v2 = vld [vmem:[#allocation5 + $0x198] sm:$0xff]  }
  0x37   :  { %892 = vmatprep.subr.bf16.mxu1 %v973_v17  ;;  %v216_v46 = vrot.slane %v194_v43, %v1150_v35  ;;  %v195_v48 = vcombine.high %v1155_v45, %v1155_v45  ;;  %v224_v49 = vcombine.high %v202_v44, %v202_v44  ;;  %v1006_v3 = vld [vmem:[#allocation5 + $0x1e0] sm:$0xff]   ;;  %v1009_v5 = vld [vmem:[#allocation5 + $0x168] sm:$0xff]   ;;  %v1013_v9 = vld [vmem:[#allocation5 + $0x170] sm:$0xff]   ;;  %v209_v17 = vrot.slane %v1155_v45, %v1150_v35 }
  0x38   :  { %v1007_v4 = vld [vmem:[#allocation5 + $0x120] sm:$0xff]   ;;  %v1010_v7 = vld [vmem:[#allocation5 + $0x1e8] sm:$0xff]   ;;  %v1014_v11 = vld [vmem:[#allocation5 + $0x1f0] sm:$0xff]  }
  0x39   :  { %871 = vmatpush3.bf16.msra.mxu0 %v974_v18  ;;  %652 = vmatprep.mubr.bf16.mxu0 %v216_v46  ;;  %v226_v51 = vcombine.high %v216_v46, %v216_v46  ;;  %v223_v53 = vrot.slane %v195_v48, %v1150_v35  ;;  %v1008_v6 = vld [vmem:[#allocation5 + $0x1a0] sm:$0xff]   ;;  %v1011_v8 = vld [vmem:[#allocation5 + $0x128] sm:$0xff]   ;;  %v1015_v12 = vld [vmem:[#allocation5 + $0x130] sm:$0xff]  }
  0x3a   :  { %893 = vmatpush3.bf16.msra.mxu1 %v975_v19  ;;  %872 = vmatprep.subr.bf16.mxu0 %v976_v20  ;;  %v1012_v10 = vld [vmem:[#allocation5 + $0x1a8] sm:$0xff]   ;;  %v1017_v13 = vld [vmem:[#allocation5 + $0x178] sm:$0xff]   ;;  %v1016_v14 = vld [vmem:[#allocation5 + $0x1b0] sm:$0xff]   ;;  %v225_v19 = vcombine.high %v209_v17, %v209_v17 }
  0x3b   :  { %894 = vmatprep.subr.bf16.mxu1 %v977_v21  ;;  %692 = vmatprep.mubr.bf16.mxu1 %v226_v51  ;;  %v227_v56 = vcombine.high %v223_v53, %v223_v53  ;;  %v1018_v15 = vld [vmem:[#allocation5 + $0x1f8] sm:$0xff]  }
  0x3c   :  { %v1019_v16 = vld [vmem:[#allocation5 + $0x138] sm:$0xff]  }
  0x3d   :  { %873 = vmatpush3.bf16.msra.mxu0 %v978_v25  ;;  %v1020_v18 = vld [vmem:[#allocation5 + $0x1b8] sm:$0xff]  }
  0x3e   :  { %895 = vmatpush3.bf16.msra.mxu1 %v979_v26  ;;  %874 = vmatprep.subr.bf16.mxu0 %v980_v27  ;;  %v797_v21 = vld [vmem:[%s1180_s2] ss:$0 sm:$0xff]  ;;  %s787_s2 = sshll.u32 %s1098_s11, 4  ;;  %s788_s2 = int_to_ptr.vmem [resolvable:$true] %s787_s2 }
  0x3f   :  { %896 = vmatprep.subr.bf16.mxu1 %v981_v28  ;;  %s1065_s12 = scalar_lea.vmem %s788_s2, 32  ;;  %p1070_p3 = scmp.lt.s32.totalorder %s788_s2, %s788_s2 }
  0x40   :  { %p1066_p2 = scmp.ne.s32.totalorder %s788_s2, %s1065_s12  ;;  %p1071_p4 = scmp.lt.s32.totalorder %s1065_s12, %s1065_s12 }
  0x41   :  { %875 = vmatpush3.bf16.msra.mxu0 %v982_v31 }
  0x42   :  { %897 = vmatpush3.bf16.msra.mxu1 %v983_v32  ;;  %876 = vmatprep.subr.bf16.mxu0 %v984_v33  ;;  %p1072_p5 = por %p1071_p4, %p1070_p3 }
  0x43   :  { %898 = vmatprep.subr.bf16.mxu1 %v985_v34 }
  0x44   :  { %p1073_p6 = pnand %p1072_p5, %p1066_p2 }
  0x45   :  { %877 = vmatpush3.bf16.msra.mxu0 %v986_v36 }
  0x46   :  { %899 = vmatpush3.bf16.msra.mxu1 %v987_v37  ;;  %906 = vmatprep.subr.bf16.mxu0 %v989_v41 }
  0x47   :  { %928 = vmatprep.subr.bf16.mxu1 %v990_v42 }
  0x48   :  { %653 = vmatmul.mubr.bf16.vlgmr.msra.gmra.mrb[0].mxu0 %v202_v44 }
  0x49   :  { %907 = vmatpush3.bf16.msra.mxu0 %v991_v47  ;;  %693 = vmatmul.mubr.bf16.vlgmr.msra.gmra.mrb[0].mxu1 %v224_v49 }
  0x4a   :  { %908 = vmatprep.subr.bf16.mxu0 %v993_v50  ;;  %929 = vmatpush3.bf16.msra.mxu1 %v992_v52 }
  0x4b   :  { %732 = vmatprep.mubr.bf16.mxu0 %v223_v53  ;;  %930 = vmatprep.subr.bf16.mxu1 %v994_v54 }
  0x4c   :  { %772 = vmatprep.mubr.bf16.mxu1 %v227_v56 }
  0x4d   :  { %909 = vmatpush3.bf16.msra.mxu0 %v995_v55 }
  0x4e   :  { %910 = vmatprep.subr.bf16.mxu0 %v997_v57  ;;  %931 = vmatpush3.bf16.msra.mxu1 %v996_v58 }
  0x4f   :  { %932 = vmatprep.subr.bf16.mxu1 %v998_v59 }
  0x51   :  { %911 = vmatpush3.bf16.msra.mxu0 %v999_v60 }
  0x52   :  { %912 = vmatprep.subr.bf16.mxu0 %v1001_v61  ;;  %933 = vmatpush3.bf16.msra.mxu1 %v1000_v62 }
  0x53   :  { %934 = vmatprep.subr.bf16.mxu1 %v1002_v63 }
  0x55   :  { %913 = vmatpush3.bf16.msra.mxu0 %v1003_v0 }
  0x56   :  { %914 = vmatprep.subr.bf16.mxu0 %v1005_v1  ;;  %935 = vmatpush3.bf16.msra.mxu1 %v1004_v2 }
  0x57   :  { %936 = vmatprep.subr.bf16.mxu1 %v1006_v3 }
  0x59   :  { %915 = vmatpush3.bf16.msra.mxu0 %v1007_v4 }
  0x5a   :  { %916 = vmatprep.subr.bf16.mxu0 %v1009_v5  ;;  %937 = vmatpush3.bf16.msra.mxu1 %v1008_v6 }
  0x5b   :  { %938 = vmatprep.subr.bf16.mxu1 %v1010_v7 }
  0x5d   :  { %917 = vmatpush3.bf16.msra.mxu0 %v1011_v8 }
  0x5e   :  { %918 = vmatprep.subr.bf16.mxu0 %v1013_v9  ;;  %939 = vmatpush3.bf16.msra.mxu1 %v1012_v10 }
  0x5f   :  { %940 = vmatprep.subr.bf16.mxu1 %v1014_v11 }
  0x61   :  { %919 = vmatpush3.bf16.msra.mxu0 %v1015_v12 }
  0x62   :  { %920 = vmatprep.subr.bf16.mxu0 %v1017_v13  ;;  %941 = vmatpush3.bf16.msra.mxu1 %v1016_v14 }
  0x63   :  { %942 = vmatprep.subr.bf16.mxu1 %v1018_v15 }
  0x65   :  { %921 = vmatpush3.bf16.msra.mxu0 %v1019_v16 }
  0x66   :  { %943 = vmatpush3.bf16.msra.mxu1 %v1020_v18 }
  0x68   :  { %733 = vmatmul.mubr.bf16.vlgmr.msra.gmra.mrb[4].mxu0 %v209_v17 }
  0x69   :  { %773 = vmatmul.mubr.bf16.vlgmr.msra.gmra.mrb[4].mxu1 %v225_v19 }
 0x11b   :  { %v878_v20 = vpop.f32.mrb[0].mxu0 }
 0x11c   :  { %v879_v22 = vpop.f32.mrb[1].mxu0  ;;  %v900_v23 = vpop.f32.mrb[0].mxu1 }
 0x11d   :  { %v880_v24 = vadd.f32 %v879_v22, %v878_v20  ;;  %v881_v25 = vpop.f32.mrb[2].mxu0  ;;  %v901_v26 = vpop.f32.mrb[1].mxu1 }
 0x11e   :  { %v882_v27 = vpop.f32.mrb[3].mxu0  ;;  %v902_v29 = vadd.f32 %v901_v26, %v900_v23  ;;  %v903_v30 = vpop.f32.mrb[2].mxu1 }
 0x11f   :  { %v655_v28 = vadd.f32 %v880_v24, %v797_v21  ;;  %v904_v31 = vpop.f32.mrb[3].mxu1 }
 0x121   :  { %v695_v32 = vadd.f32 %v902_v29, %v655_v28 }
 0x13b   :  { %v922_v33 = vpop.f32.mrb[4].mxu0 }
 0x13c   :  { %v923_v34 = vpop.f32.mrb[5].mxu0  ;;  %v944_v35 = vpop.f32.mrb[4].mxu1 }
 0x13d   :  { %v924_v36 = vadd.f32 %v923_v34, %v922_v33  ;;  %v925_v37 = vpop.f32.mrb[6].mxu0  ;;  %v945_v38 = vpop.f32.mrb[5].mxu1 }
 0x13e   :  { %v926_v39 = vpop.f32.mrb[7].mxu0  ;;  %v946_v41 = vadd.f32 %v945_v38, %v944_v35  ;;  %v947_v42 = vpop.f32.mrb[6].mxu1 }
 0x13f   :  { %v735_v40 = vadd.f32 %v924_v36, %v695_v32  ;;  %v948_v43 = vpop.f32.mrb[7].mxu1 }
 0x141   :  { %v775_v44 = vadd.f32 %v946_v41, %v735_v40 }
 0x143   :  { %780 = vst [vmem:[#allocation7] sm:$0x3] %v775_v44 }
 0x144   :  { %1076 = shalt.err (!%p1073_p6)
}
 0x145   :  { %s1077_s15 = scalar_lea.hbm %s1181_s3, 32 }
 0x146   :  { %p1078_p7 = scmp.ne.s32.totalorder %s1181_s3, %s1077_s15  ;;  %p1081_p8 = scmp.lt.u32.totalorder %s1077_s15, %s1181_s3 }
 0x148   :  { %p1083_p9 = pnand %p1081_p8, %p1078_p7 }
 0x14a   :  { %1086 = shalt.err (!%p1083_p9)
}
 0x14b   :  { %790 = dma.vmem_to_hbm [thread:$0]  %s788_s2, 32, %s1181_s3, [#allocation4]  }
 0x14c   :  { %1091 = dma.done.wait [#allocation4], 32  }
 0x14d   :  { %1092 = vsyncadd [#allocation4], 4294967264 }
 0x14e   :  { %794 = vsyncpa [#allocation3], 1 }
 0x14f   :  { %795 = vsyncpa [#allocation6], 1 }
 0x150   :  { %796 = vsyncpa [#allocation4], 1 }

</bundles_post_ra>
